<compile_context>
chip_gen: v7x
topology: tpu7x:2x2x1
jax: 0.10.0
libtpu: 0.0.40
codegen_flags: <defaults>
</compile_context>

<pallas_src>
import functools
import numpy as np
import jax
import jax.numpy as jnp
from jax.experimental import pallas as pl
from jax.experimental.pallas import tpu as pltpu

WIN_SIZE = 11
WIN_SIGMA = 1.5
K1, K2 = 0.01, 0.03


def _gauss_1d(win_size, sigma):
    coords = np.arange(win_size, dtype=np.float64) - win_size // 2
    g = np.exp(-(coords ** 2) / (2.0 * sigma ** 2))
    g = g / g.sum()
    return g.astype(np.float32)


def _valid_conv_matrix(size_in, win):
    # Toeplitz band matrix M (size_out, size_in): (M @ v)[i] = sum_k win[k]*v[i+k]
    size_out = size_in - win.shape[0] + 1
    m = np.zeros((size_out, size_in), dtype=np.float32)
    for i in range(size_out):
        m[i, i:i + win.shape[0]] = win
    return m


def _block_diag(m, reps):
    if reps == 1:
        return m
    r, c = m.shape
    out = np.zeros((reps * r, reps * c), dtype=m.dtype)
    for k in range(reps):
        out[k * r:(k + 1) * r, k * c:(k + 1) * c] = m
    return out


def _pack(planes, total_blocks, q, p, hp, wp):
    # (nc, H, W) -> (total_blocks, Q*Hp, P*Wp); plane (q, p) occupies the
    # sub-tile [q*Hp:(q+1)*Hp, p*Wp:(p+1)*Wp]. Padded planes / pixels are 0.
    nc, h, w = planes.shape
    total_planes = total_blocks * q * p
    planes = jnp.pad(planes, ((0, total_planes - nc), (0, hp - h), (0, wp - w)))
    packed = planes.reshape(total_blocks, q, p, hp, wp).transpose(0, 1, 3, 2, 4)
    return packed.reshape(total_blocks, q * hp, p * wp)


def _tpu_kind():
    try:
        return jax.devices()[0].device_kind.lower()
    except Exception:
        return ""


def _tpu_vmem_bytes():
    try:
        return int(pltpu.get_tpu_info().vmem_capacity_bytes)
    except Exception:
        return 64 * 2 ** 20       # conservative (v7x per-TensorCore)


def _combined_loss_kernel(recon_ref, x_ref, a_ref, bt_ref,
                          osq_ref, oabs_ref, ossim_ref,
                          fs_ref, acc_sq, acc_abs, acc_ssim,
                          *, c1, c2):
    j = pl.program_id(1)

    @pl.when(j == 0)
    def _():
        acc_sq[...] = jnp.zeros_like(acc_sq)
        acc_abs[...] = jnp.zeros_like(acc_abs)
        acc_ssim[...] = jnp.zeros_like(acc_ssim)

    r = recon_ref[...]                       # (QHp, PWp) f32
    x = x_ref[...]
    qh, pw = r.shape

    # ---- MSE / L1 partials: fold rows into one (8, PWp) vreg-row partial ----
    # (pure VPU adds; the single cross-lane reduction happens in the final when)
    d = r - x
    dsq = d * d
    dab = jnp.abs(d)
    sq_p = acc_sq[...]
    ab_p = acc_abs[...]
    for si in range(qh // 8):
        sq_p = sq_p + dsq[si * 8:(si + 1) * 8, :]
        ab_p = ab_p + dab[si * 8:(si + 1) * 8, :]
    acc_sq[...] = sq_p
    acc_abs[...] = ab_p

    # ---- SSIM: convolve r, x, r*r, x*x, r*x directly (bf16 operands); the
    # (.+1)/2 rescale is applied as an affine fix-up on the small output maps.
    fs_ref[:, 0 * pw:1 * pw] = r.astype(jnp.bfloat16)
    fs_ref[:, 1 * pw:2 * pw] = x.astype(jnp.bfloat16)
    fs_ref[:, 2 * pw:3 * pw] = (r * r).astype(jnp.bfloat16)
    fs_ref[:, 3 * pw:4 * pw] = (x * x).astype(jnp.bfloat16)
    fs_ref[:, 4 * pw:5 * pw] = (r * x).astype(jnp.bfloat16)

    # Fused first-stage (row) Gaussian conv: ONE bf16 matmul over the five
    # lane-concatenated operands (each chunk is a multiple of 128 lanes).
    t = jnp.dot(a_ref[...], fs_ref[...],
                preferred_element_type=jnp.float32)          # (QHout, 5*PWp)

    bt = bt_ref[...]                                         # (PWp, PWout) bf16

    def col_filt(k):         # second-stage (column) conv, lane-aligned slice
        return jnp.dot(t[:, k * pw:(k + 1) * pw].astype(jnp.bfloat16), bt,
                       preferred_element_type=jnp.float32)   # (QHout, PWout)

    gr = col_filt(0)          # G[r]
    gx = col_filt(1)          # G[x]
    grr = col_filt(2)         # G[r*r]
    gxx = col_filt(3)         # G[x*x]
    grx = col_filt(4)         # G[r*x]

    # Affine correction (G is linear, window sums to 1):
    #   mu1 = G[(r+1)/2] = (G[r]+1)/2, etc.
    mu1 = (gr + 1.0) * 0.5
    mu2 = (gx + 1.0) * 0.5
    mu1_sq = mu1 * mu1
    mu2_sq = mu2 * mu2
    mu1_mu2 = mu1 * mu2
    g11 = (grr + 2.0 * gr + 1.0) * 0.25
    g22 = (gxx + 2.0 * gx + 1.0) * 0.25
    g12 = (grx + gr + gx + 1.0) * 0.25
    sigma1_sq = g11 - mu1_sq
    sigma2_sq = g22 - mu2_sq
    sigma12 = g12 - mu1_mu2

    num = (2.0 * mu1_mu2 + c1) * (2.0 * sigma12 + c2)
    den = (mu1_sq + mu2_sq + c1) * (sigma1_sq + sigma2_sq + c2)
    acc_ssim[...] += num * pl.reciprocal(den, approx=True)   # EUP slot, ~free

    @pl.when(j == pl.num_programs(1) - 1)
    def _():
        osq_ref[...] = jnp.sum(acc_sq[...], keepdims=True)
        oabs_ref[...] = jnp.sum(acc_abs[...], keepdims=True)
        ossim_ref[...] = jnp.sum(acc_ssim[...], keepdims=True)


def combined_loss(recon, x, alpha=0.5, beta=0.3, gamma=0.2, data_range=1.0):
    assert recon.shape == x.shape and recon.ndim == 4
    n, c, h, w = recon.shape
    nc = n * c
    hout = h - WIN_SIZE + 1
    wout = w - WIN_SIZE + 1
    assert hout > 0 and wout > 0, "spatial dims must be >= 11 for SSIM window"

    # ---- generation-aware knobs -------------------------------------------
    kind = _tpu_kind()
    is_pre_v6 = any(t in kind for t in ("v2", "v3", "v4", "v5"))
    pack_target = 128 if is_pre_v6 else 256        # contraction / lane target
    two_tc = "v7" in kind                          # 2 TensorCores per chip
    phys_vmem = _tpu_vmem_bytes()
    vmem_cap = (phys_vmem * 2) // 3                # never request > ~2/3 physical
    block_budget = min(vmem_cap, 40 * 2 ** 20)

    # ---- packing geometry -------------------------------------------------
    hp = -(-h // 8) * 8                            # sublane-align H
    if w > 128:
        wp = -(-w // 128) * 128                    # lane multiple
    else:
        wp = next(dd for dd in (16, 32, 64, 128) if dd >= w)
    if wp >= 128:
        p_min = 1
        p_max = max(1, pack_target // wp)
    else:
        p_min = 128 // wp                          # keeps P*Wp a multiple of 128
        p_max = max(p_min, pack_target // wp)
    p = p_min * (-(-min(nc, p_max) // p_min))      # planes along lanes
    rem = -(-nc // p)
    q = min(rem, max(1, pack_target // hp))        # planes along sublanes

    def vmem_est(q_, p_):
        qh_, pwp_ = q_ * hp, p_ * wp
        qhout_, pwout_ = q_ * hout, p_ * wout
        return (16 * qh_ * pwp_                      # f32 inputs, double-buffered
                + 10 * qh_ * pwp_                    # bf16 fs scratch
                + 12 * qh_ * pwp_                    # live f32 temporaries
                + 30 * qhout_ * pwp_                 # t (f32 + bf16 copy)
                + 40 * qhout_ * pwout_               # ssim-map temporaries
                + 4 * (qhout_ * qh_ + pwp_ * pwout_)  # bf16 constants x2 buffers
                + 64 * pwp_ + 4 * qhout_ * pwout_)   # small accumulators

    while vmem_est(q, p) > block_budget and q > 1:
        q = max(1, q // 2)
    while vmem_est(q, p) > block_budget and p > p_min:
        p = max(p_min, ((p // 2) // p_min) * p_min)
    # TODO(synk): for very large frames (H, W >> 128) the dense Toeplitz conv
    # no longer fits v7x's 64 MiB VMEM; switch to an 11-tap shifted-add
    # (pltpu.roll) separable conv / lane-tiled grid with halo instead.

    rem = -(-nc // p)
    g = -(-rem // q)                               # packed blocks
    nsplit = 2 if (two_tc and g >= 2) else 1       # only split on 2-TC chips
    g2 = -(-g // nsplit)
    total_blocks = nsplit * g2
    total_planes = total_blocks * q * p

    qh, pwp = q * hp, p * wp                       # pwp is a multiple of 128
    qhout, pwout = q * hout, p * wout

    # ---- Toeplitz "valid" Gaussian-conv constants (block-diagonal, bf16) ---
    gauss = _gauss_1d(WIN_SIZE, WIN_SIGMA)
    a = np.pad(_valid_conv_matrix(h, gauss), ((0, 0), (0, hp - h)))       # (Hout, Hp)
    bt = np.pad(_valid_conv_matrix(w, gauss).T, ((0, wp - w), (0, 0)))    # (Wp, Wout)
    a_big = jnp.asarray(_block_diag(a, q), dtype=jnp.bfloat16)    # (QHout, QHp)
    bt_big = jnp.asarray(_block_diag(bt, p), dtype=jnp.bfloat16)  # (PWp, PWout)

    recon_p = _pack(recon.reshape(nc, h, w).astype(jnp.float32),
                    total_blocks, q, p, hp, wp)
    x_p = _pack(x.reshape(nc, h, w).astype(jnp.float32),
                total_blocks, q, p, hp, wp)

    c1 = (K1 * data_range) ** 2
    c2 = (K2 * data_range) ** 2
    kernel = functools.partial(_combined_loss_kernel, c1=float(c1), c2=float(c2))

    vmem_limit = int(min(vmem_cap, max(32 * 2 ** 20, int(1.5 * vmem_est(q, p)))))

    osq, oabs, ossim = pl.pallas_call(
        kernel,
        out_shape=(jax.ShapeDtypeStruct((nsplit, 1, 1), jnp.float32),) * 3,
        grid_spec=pltpu.PrefetchScalarGridSpec(
            num_scalar_prefetch=0,
            grid=(nsplit, g2),
            in_specs=[
                pl.BlockSpec((None, qh, pwp), lambda i, j: (i * g2 + j, 0, 0)),
                pl.BlockSpec((None, qh, pwp), lambda i, j: (i * g2 + j, 0, 0)),
                # TODO(synk): pipeline_mode=pl.Buffered(1) on these constant
                # operands would drop their second VMEM buffer for wide frames.
                pl.BlockSpec((qhout, qh), lambda i, j: (0, 0)),
                pl.BlockSpec((pwp, pwout), lambda i, j: (0, 0)),
            ],
            out_specs=[
                pl.BlockSpec((None, 1, 1), lambda i, j: (i, 0, 0)),
                pl.BlockSpec((None, 1, 1), lambda i, j: (i, 0, 0)),
                pl.BlockSpec((None, 1, 1), lambda i, j: (i, 0, 0)),
            ],
            scratch_shapes=[pltpu.VMEM((qh, 5 * pwp), jnp.bfloat16),  # fs
                            pltpu.VMEM((8, pwp), jnp.float32),        # acc_sq
                            pltpu.VMEM((8, pwp), jnp.float32),        # acc_abs
                            pltpu.VMEM((qhout, pwout), jnp.float32)], # acc_ssim
        ),
        compiler_params=pltpu.CompilerParams(
            dimension_semantics=("parallel", "arbitrary"),
            vmem_limit_bytes=vmem_limit),
    )(recon_p, x_p, a_big, bt_big)

    sum_sq = jnp.sum(osq)
    sum_abs = jnp.sum(oabs)
    sum_ssim = jnp.sum(ossim)

    n_pix = float(nc * h * w)
    n_ssim = float(nc * hout * wout)
    # zero-padded planes contribute exactly 1.0 per SSIM-map pixel and 0 to MSE/L1
    pad_ssim = float((total_planes - nc) * hout * wout)

    mse = sum_sq / n_pix
    l1 = sum_abs / n_pix
    s = (sum_ssim - pad_ssim) / n_ssim
    return alpha * mse + beta * l1 + gamma * (1.0 - s)


def reference_loss(recon, x, alpha=0.5, beta=0.3, gamma=0.2, data_range=1.0):
    # Pure-JAX reference of the same math (for correctness checking only).
    n, c, h, w = x.shape
    m = jnp.mean((recon - x) ** 2)
    l = jnp.mean(jnp.abs(recon - x))
    x01 = (x + 1.0) / 2.0
    r01 = (recon + 1.0) / 2.0
    g = _gauss_1d(WIN_SIZE, WIN_SIGMA)
    A = jnp.asarray(_valid_conv_matrix(h, g))
    B = jnp.asarray(_valid_conv_matrix(w, g))

    def gf(img):
        t = jnp.einsum('oh,nchw->ncow', A, img, precision='highest')
        return jnp.einsum('pw,ncow->ncop', B, t, precision='highest')

    mu1, mu2 = gf(r01), gf(x01)
    mu1_sq, mu2_sq, mu1_mu2 = mu1 * mu1, mu2 * mu2, mu1 * mu2
    sigma1_sq = gf(r01 * r01) - mu1_sq
    sigma2_sq = gf(x01 * x01) - mu2_sq
    sigma12 = gf(r01 * x01) - mu1_mu2
    c1, c2 = (K1 * data_range) ** 2, (K2 * data_range) ** 2
    cs_map = (2.0 * sigma12 + c2) / (sigma1_sq + sigma2_sq + c2)
    ssim_map = ((2.0 * mu1_mu2 + c1) / (mu1_sq + mu2_sq + c1)) * cs_map
    s = jnp.mean(ssim_map)
    return alpha * m + beta * l + gamma * (1.0 - s)


if __name__ == "__main__":
    key = jax.random.PRNGKey(0)

    def run_case(shape, tag):
        k1, k2 = jax.random.split(jax.random.fold_in(key, tag))
        x = jax.random.uniform(k1, shape, jnp.float32, -1.0, 1.0)
        recon = jnp.clip(
            x + 0.1 * jax.random.normal(k2, shape, jnp.float32), -1.0, 1.0)
        loss = jax.block_until_ready(combined_loss(recon, x, 0.5, 0.3, 0.2))
        ref = reference_loss(recon, x, 0.5, 0.3, 0.2)
        assert np.isfinite(float(loss))
        np.testing.assert_allclose(float(loss), float(ref), rtol=1e-2, atol=1e-2)

    run_case((2, 4, 16, 16), 0)    # 8 planes lane-packed into one block
    run_case((7, 1, 20, 24), 1)    # unaligned H/W + zero-padded planes
    run_case((16, 8, 16, 16), 2)   # full 256-wide packing on v6e/v7x
    run_case((32, 4, 20, 24), 3)   # multi-block grid: accumulation over j
    print("KERNEL_OK")
</pallas_src>

<mosaic_0001>
module attributes {stable_mosaic.version = 11 : i64} {
  func.func @_combined_loss_kernel(%arg0: i32, %arg1: i32, %arg2: memref<1x16x128xf32, #tpu.memory_space<vmem>>, %arg3: memref<1x16x128xf32, #tpu.memory_space<vmem>>, %arg4: memref<6x16xbf16, #tpu.memory_space<vmem>>, %arg5: memref<128x48xbf16, #tpu.memory_space<vmem>>, %arg6: memref<1x1x1xf32, #tpu.memory_space<vmem>>, %arg7: memref<1x1x1xf32, #tpu.memory_space<vmem>>, %arg8: memref<1x1x1xf32, #tpu.memory_space<vmem>>, %arg9: memref<16x640xbf16, #tpu.memory_space<vmem>>, %arg10: memref<8x128xf32, #tpu.memory_space<vmem>>, %arg11: memref<8x128xf32, #tpu.memory_space<vmem>>, %arg12: memref<6x48xf32, #tpu.memory_space<vmem>>) attributes {dimension_semantics = [#tpu.dimension_semantics<parallel>, #tpu.dimension_semantics<arbitrary>], iteration_bounds = array<i64: 1, 1>, scalar_prefetch = 0 : i64, scratch_operands = 4 : i64, tpu.core_type = #tpu.core_type<tc>, window_params = [{transform_indices = @transform_0, window_bounds = array<i64: 1, 16, 128>}, {transform_indices = @transform_1, window_bounds = array<i64: 1, 16, 128>}, {pipeline_mode = #tpu.pipeline_mode<synchronous>, transform_indices = @transform_2, window_bounds = array<i64: 6, 16>}, {pipeline_mode = #tpu.pipeline_mode<synchronous>, transform_indices = @transform_3, window_bounds = array<i64: 128, 48>}, {transform_indices = @transform_4, window_bounds = array<i64: 1, 1, 1>}, {transform_indices = @transform_5, window_bounds = array<i64: 1, 1, 1>}, {transform_indices = @transform_6, window_bounds = array<i64: 1, 1, 1>}]} {
    %c0_i32 = arith.constant 0 : i32
    %0 = arith.cmpi eq, %arg1, %c0_i32 : i32
    %1 = arith.extui %0 : i1 to i32
    %c0_i32_0 = arith.constant 0 : i32
    %2 = arith.cmpi ne, %1, %c0_i32_0 : i32
    scf.if %2 {
      %cst_55 = arith.constant 0.000000e+00 : f32
      %112 = vector.broadcast %cst_55 : f32 to vector<8x128xf32>
      %c0_56 = arith.constant 0 : index
      %c0_57 = arith.constant 0 : index
      %113 = vector.load %arg10[%c0_56, %c0_57] : memref<8x128xf32, #tpu.memory_space<vmem>>, vector<8x128xf32>
      tpu.vector_store %arg10[%c0_56, %c0_57], %112 {strides = array<i32>} : memref<8x128xf32, #tpu.memory_space<vmem>>, vector<8x128xf32>,
      %cst_58 = arith.constant 0.000000e+00 : f32
      %114 = vector.broadcast %cst_58 : f32 to vector<8x128xf32>
      %c0_59 = arith.constant 0 : index
      %c0_60 = arith.constant 0 : index
      %115 = vector.load %arg11[%c0_59, %c0_60] : memref<8x128xf32, #tpu.memory_space<vmem>>, vector<8x128xf32>
      tpu.vector_store %arg11[%c0_59, %c0_60], %114 {strides = array<i32>} : memref<8x128xf32, #tpu.memory_space<vmem>>, vector<8x128xf32>,
      %cst_61 = arith.constant 0.000000e+00 : f32
      %116 = vector.broadcast %cst_61 : f32 to vector<6x48xf32>
      %c0_62 = arith.constant 0 : index
      %c0_63 = arith.constant 0 : index
      %117 = vector.load %arg12[%c0_62, %c0_63] : memref<6x48xf32, #tpu.memory_space<vmem>>, vector<6x48xf32>
      tpu.vector_store %arg12[%c0_62, %c0_63], %116 {strides = array<i32>} : memref<6x48xf32, #tpu.memory_space<vmem>>, vector<6x48xf32>,
    } else {
    }
    %c0 = arith.constant 0 : index
    %c0_1 = arith.constant 0 : index
    %c0_2 = arith.constant 0 : index
    %3 = vector.load %arg2[%c0, %c0_1, %c0_2] : memref<1x16x128xf32, #tpu.memory_space<vmem>>, vector<1x16x128xf32>
    %4 = vector.shape_cast %3 : vector<1x16x128xf32> to vector<16x128xf32>
    %c0_3 = arith.constant 0 : index
    %c0_4 = arith.constant 0 : index
    %c0_5 = arith.constant 0 : index
    %5 = vector.load %arg3[%c0_3, %c0_4, %c0_5] : memref<1x16x128xf32, #tpu.memory_space<vmem>>, vector<1x16x128xf32>
    %6 = vector.shape_cast %5 : vector<1x16x128xf32> to vector<16x128xf32>
    %7 = arith.subf %4, %6 : vector<16x128xf32>
    %8 = arith.mulf %7, %7 : vector<16x128xf32>
    %9 = math.absf %7 : vector<16x128xf32>
    %c0_6 = arith.constant 0 : index
    %c0_7 = arith.constant 0 : index
    %10 = vector.load %arg10[%c0_6, %c0_7] : memref<8x128xf32, #tpu.memory_space<vmem>>, vector<8x128xf32>
    %c0_8 = arith.constant 0 : index
    %c0_9 = arith.constant 0 : index
    %11 = vector.load %arg11[%c0_8, %c0_9] : memref<8x128xf32, #tpu.memory_space<vmem>>, vector<8x128xf32>
    %12 = vector.extract_strided_slice %8 {offsets = [0, 0], sizes = [8, 128], strides = [1, 1]} : vector<16x128xf32> to vector<8x128xf32>
    %13 = arith.addf %10, %12 : vector<8x128xf32>
    %14 = vector.extract_strided_slice %9 {offsets = [0, 0], sizes = [8, 128], strides = [1, 1]} : vector<16x128xf32> to vector<8x128xf32>
    %15 = arith.addf %11, %14 : vector<8x128xf32>
    %16 = vector.extract_strided_slice %8 {offsets = [8, 0], sizes = [8, 128], strides = [1, 1]} : vector<16x128xf32> to vector<8x128xf32>
    %17 = arith.addf %13, %16 : vector<8x128xf32>
    %18 = vector.extract_strided_slice %9 {offsets = [8, 0], sizes = [8, 128], strides = [1, 1]} : vector<16x128xf32> to vector<8x128xf32>
    %19 = arith.addf %15, %18 : vector<8x128xf32>
    %c0_10 = arith.constant 0 : index
    %c0_11 = arith.constant 0 : index
    %20 = vector.load %arg10[%c0_10, %c0_11] : memref<8x128xf32, #tpu.memory_space<vmem>>, vector<8x128xf32>
    tpu.vector_store %arg10[%c0_10, %c0_11], %17 {strides = array<i32>} : memref<8x128xf32, #tpu.memory_space<vmem>>, vector<8x128xf32>,
    %c0_12 = arith.constant 0 : index
    %c0_13 = arith.constant 0 : index
    %21 = vector.load %arg11[%c0_12, %c0_13] : memref<8x128xf32, #tpu.memory_space<vmem>>, vector<8x128xf32>
    tpu.vector_store %arg11[%c0_12, %c0_13], %19 {strides = array<i32>} : memref<8x128xf32, #tpu.memory_space<vmem>>, vector<8x128xf32>,
    %22 = arith.truncf %4 : vector<16x128xf32> to vector<16x128xbf16>
    %c0_14 = arith.constant 0 : index
    %c0_15 = arith.constant 0 : index
    %23 = vector.load %arg9[%c0_14, %c0_15] : memref<16x640xbf16, #tpu.memory_space<vmem>>, vector<16x128xbf16>
    tpu.vector_store %arg9[%c0_14, %c0_15], %22 {strides = array<i32>} : memref<16x640xbf16, #tpu.memory_space<vmem>>, vector<16x128xbf16>,
    %24 = arith.truncf %6 : vector<16x128xf32> to vector<16x128xbf16>
    %c0_16 = arith.constant 0 : index
    %c128 = arith.constant 128 : index
    %25 = vector.load %arg9[%c0_16, %c128] : memref<16x640xbf16, #tpu.memory_space<vmem>>, vector<16x128xbf16>
    tpu.vector_store %arg9[%c0_16, %c128], %24 {strides = array<i32>} : memref<16x640xbf16, #tpu.memory_space<vmem>>, vector<16x128xbf16>,
    %26 = arith.mulf %4, %4 : vector<16x128xf32>
    %27 = arith.truncf %26 : vector<16x128xf32> to vector<16x128xbf16>
    %c0_17 = arith.constant 0 : index
    %c256 = arith.constant 256 : index
    %28 = vector.load %arg9[%c0_17, %c256] : memref<16x640xbf16, #tpu.memory_space<vmem>>, vector<16x128xbf16>
    tpu.vector_store %arg9[%c0_17, %c256], %27 {strides = array<i32>} : memref<16x640xbf16, #tpu.memory_space<vmem>>, vector<16x128xbf16>,
    %29 = arith.mulf %6, %6 : vector<16x128xf32>
    %30 = arith.truncf %29 : vector<16x128xf32> to vector<16x128xbf16>
    %c0_18 = arith.constant 0 : index
    %c384 = arith.constant 384 : index
    %31 = vector.load %arg9[%c0_18, %c384] : memref<16x640xbf16, #tpu.memory_space<vmem>>, vector<16x128xbf16>
    tpu.vector_store %arg9[%c0_18, %c384], %30 {strides = array<i32>} : memref<16x640xbf16, #tpu.memory_space<vmem>>, vector<16x128xbf16>,
    %32 = arith.mulf %4, %6 : vector<16x128xf32>
    %33 = arith.truncf %32 : vector<16x128xf32> to vector<16x128xbf16>
    %c0_19 = arith.constant 0 : index
    %c512 = arith.constant 512 : index
    %34 = vector.load %arg9[%c0_19, %c512] : memref<16x640xbf16, #tpu.memory_space<vmem>>, vector<16x128xbf16>
    tpu.vector_store %arg9[%c0_19, %c512], %33 {strides = array<i32>} : memref<16x640xbf16, #tpu.memory_space<vmem>>, vector<16x128xbf16>,
    %c0_20 = arith.constant 0 : index
    %c0_21 = arith.constant 0 : index
    %35 = vector.load %arg4[%c0_20, %c0_21] : memref<6x16xbf16, #tpu.memory_space<vmem>>, vector<6x16xbf16>
    %c0_22 = arith.constant 0 : index
    %c0_23 = arith.constant 0 : index
    %36 = vector.load %arg9[%c0_22, %c0_23] : memref<16x640xbf16, #tpu.memory_space<vmem>>, vector<16x640xbf16>
    %cst = arith.constant dense<0.000000e+00> : vector<6x640xf32>
    %37 = tpu.matmul %35, %36, %cst {dimension_numbers = #tpu.dot_dimension_numbers<[1], [0], [0], [1], [0, 0, 1, 1], [], []>} : vector<6x16xbf16>, vector<16x640xbf16>, vector<6x640xf32> -> vector<6x640xf32>
    %c0_24 = arith.constant 0 : index
    %c0_25 = arith.constant 0 : index
    %38 = vector.load %arg5[%c0_24, %c0_25] : memref<128x48xbf16, #tpu.memory_space<vmem>>, vector<128x48xbf16>
    %39 = vector.extract_strided_slice %37 {offsets = [0, 0], sizes = [6, 128], strides = [1, 1]} : vector<6x640xf32> to vector<6x128xf32>
    %40 = arith.truncf %39 : vector<6x128xf32> to vector<6x128xbf16>
    %cst_26 = arith.constant dense<0.000000e+00> : vector<6x48xf32>
    %41 = tpu.matmul %40, %38, %cst_26 {dimension_numbers = #tpu.dot_dimension_numbers<[1], [0], [0], [1], [0, 0, 1, 1], [], []>} : vector<6x128xbf16>, vector<128x48xbf16>, vector<6x48xf32> -> vector<6x48xf32>
    %42 = vector.extract_strided_slice %37 {offsets = [0, 128], sizes = [6, 128], strides = [1, 1]} : vector<6x640xf32> to vector<6x128xf32>
    %43 = arith.truncf %42 : vector<6x128xf32> to vector<6x128xbf16>
    %cst_27 = arith.constant dense<0.000000e+00> : vector<6x48xf32>
    %44 = tpu.matmul %43, %38, %cst_27 {dimension_numbers = #tpu.dot_dimension_numbers<[1], [0], [0], [1], [0, 0, 1, 1], [], []>} : vector<6x128xbf16>, vector<128x48xbf16>, vector<6x48xf32> -> vector<6x48xf32>
    %45 = vector.extract_strided_slice %37 {offsets = [0, 256], sizes = [6, 128], strides = [1, 1]} : vector<6x640xf32> to vector<6x128xf32>
    %46 = arith.truncf %45 : vector<6x128xf32> to vector<6x128xbf16>
    %cst_28 = arith.constant dense<0.000000e+00> : vector<6x48xf32>
    %47 = tpu.matmul %46, %38, %cst_28 {dimension_numbers = #tpu.dot_dimension_numbers<[1], [0], [0], [1], [0, 0, 1, 1], [], []>} : vector<6x128xbf16>, vector<128x48xbf16>, vector<6x48xf32> -> vector<6x48xf32>
    %48 = vector.extract_strided_slice %37 {offsets = [0, 384], sizes = [6, 128], strides = [1, 1]} : vector<6x640xf32> to vector<6x128xf32>
    %49 = arith.truncf %48 : vector<6x128xf32> to vector<6x128xbf16>
    %cst_29 = arith.constant dense<0.000000e+00> : vector<6x48xf32>
    %50 = tpu.matmul %49, %38, %cst_29 {dimension_numbers = #tpu.dot_dimension_numbers<[1], [0], [0], [1], [0, 0, 1, 1], [], []>} : vector<6x128xbf16>, vector<128x48xbf16>, vector<6x48xf32> -> vector<6x48xf32>
    %51 = vector.extract_strided_slice %37 {offsets = [0, 512], sizes = [6, 128], strides = [1, 1]} : vector<6x640xf32> to vector<6x128xf32>
    %52 = arith.truncf %51 : vector<6x128xf32> to vector<6x128xbf16>
    %cst_30 = arith.constant dense<0.000000e+00> : vector<6x48xf32>
    %53 = tpu.matmul %52, %38, %cst_30 {dimension_numbers = #tpu.dot_dimension_numbers<[1], [0], [0], [1], [0, 0, 1, 1], [], []>} : vector<6x128xbf16>, vector<128x48xbf16>, vector<6x48xf32> -> vector<6x48xf32>
    %cst_31 = arith.constant 1.000000e+00 : f32
    %54 = vector.broadcast %cst_31 : f32 to vector<6x48xf32>
    %55 = arith.addf %41, %54 : vector<6x48xf32>
    %cst_32 = arith.constant 5.000000e-01 : f32
    %56 = vector.broadcast %cst_32 : f32 to vector<6x48xf32>
    %57 = arith.mulf %55, %56 : vector<6x48xf32>
    %cst_33 = arith.constant 1.000000e+00 : f32
    %58 = vector.broadcast %cst_33 : f32 to vector<6x48xf32>
    %59 = arith.addf %44, %58 : vector<6x48xf32>
    %cst_34 = arith.constant 5.000000e-01 : f32
    %60 = vector.broadcast %cst_34 : f32 to vector<6x48xf32>
    %61 = arith.mulf %59, %60 : vector<6x48xf32>
    %62 = arith.mulf %57, %57 : vector<6x48xf32>
    %63 = arith.mulf %61, %61 : vector<6x48xf32>
    %64 = arith.mulf %57, %61 : vector<6x48xf32>
    %cst_35 = arith.constant 2.000000e+00 : f32
    %65 = vector.broadcast %cst_35 : f32 to vector<6x48xf32>
    %66 = arith.mulf %65, %41 : vector<6x48xf32>
    %67 = arith.addf %47, %66 : vector<6x48xf32>
    %cst_36 = arith.constant 1.000000e+00 : f32
    %68 = vector.broadcast %cst_36 : f32 to vector<6x48xf32>
    %69 = arith.addf %67, %68 : vector<6x48xf32>
    %cst_37 = arith.constant 2.500000e-01 : f32
    %70 = vector.broadcast %cst_37 : f32 to vector<6x48xf32>
    %71 = arith.mulf %69, %70 : vector<6x48xf32>
    %cst_38 = arith.constant 2.000000e+00 : f32
    %72 = vector.broadcast %cst_38 : f32 to vector<6x48xf32>
    %73 = arith.mulf %72, %44 : vector<6x48xf32>
    %74 = arith.addf %50, %73 : vector<6x48xf32>
    %cst_39 = arith.constant 1.000000e+00 : f32
    %75 = vector.broadcast %cst_39 : f32 to vector<6x48xf32>
    %76 = arith.addf %74, %75 : vector<6x48xf32>
    %cst_40 = arith.constant 2.500000e-01 : f32
    %77 = vector.broadcast %cst_40 : f32 to vector<6x48xf32>
    %78 = arith.mulf %76, %77 : vector<6x48xf32>
    %79 = arith.addf %53, %41 : vector<6x48xf32>
    %80 = arith.addf %79, %44 : vector<6x48xf32>
    %cst_41 = arith.constant 1.000000e+00 : f32
    %81 = vector.broadcast %cst_41 : f32 to vector<6x48xf32>
    %82 = arith.addf %80, %81 : vector<6x48xf32>
    %cst_42 = arith.constant 2.500000e-01 : f32
    %83 = vector.broadcast %cst_42 : f32 to vector<6x48xf32>
    %84 = arith.mulf %82, %83 : vector<6x48xf32>
    %85 = arith.subf %71, %62 : vector<6x48xf32>
    %86 = arith.subf %78, %63 : vector<6x48xf32>
    %87 = arith.subf %84, %64 : vector<6x48xf32>
    %cst_43 = arith.constant 2.000000e+00 : f32
    %88 = vector.broadcast %cst_43 : f32 to vector<6x48xf32>
    %89 = arith.mulf %88, %64 : vector<6x48xf32>
    %cst_44 = arith.constant 9.99999974E-5 : f32
    %90 = vector.broadcast %cst_44 : f32 to vector<6x48xf32>
    %91 = arith.addf %89, %90 : vector<6x48xf32>
    %cst_45 = arith.constant 2.000000e+00 : f32
    %92 = vector.broadcast %cst_45 : f32 to vector<6x48xf32>
    %93 = arith.mulf %92, %87 : vector<6x48xf32>
    %cst_46 = arith.constant 8.99999984E-4 : f32
    %94 = vector.broadcast %cst_46 : f32 to vector<6x48xf32>
    %95 = arith.addf %93, %94 : vector<6x48xf32>
    %96 = arith.mulf %91, %95 : vector<6x48xf32>
    %97 = arith.addf %62, %63 : vector<6x48xf32>
    %cst_47 = arith.constant 9.99999974E-5 : f32
    %98 = vector.broadcast %cst_47 : f32 to vector<6x48xf32>
    %99 = arith.addf %97, %98 : vector<6x48xf32>
    %100 = arith.addf %85, %86 : vector<6x48xf32>
    %cst_48 = arith.constant 8.99999984E-4 : f32
    %101 = vector.broadcast %cst_48 : f32 to vector<6x48xf32>
    %102 = arith.addf %100, %101 : vector<6x48xf32>
    %103 = arith.mulf %99, %102 : vector<6x48xf32>
    %c0_49 = arith.constant 0 : index
    %c0_50 = arith.constant 0 : index
    %104 = vector.load %arg12[%c0_49, %c0_50] : memref<6x48xf32, #tpu.memory_space<vmem>>, vector<6x48xf32>
    %105 = tpu.reciprocal %103 {approx = true} : vector<6x48xf32> -> vector<6x48xf32>
    %106 = arith.mulf %96, %105 : vector<6x48xf32>
    %107 = arith.addf %104, %106 : vector<6x48xf32>
    %c0_51 = arith.constant 0 : index
    %c0_52 = arith.constant 0 : index
    %108 = vector.load %arg12[%c0_51, %c0_52] : memref<6x48xf32, #tpu.memory_space<vmem>>, vector<6x48xf32>
    tpu.vector_store %arg12[%c0_51, %c0_52], %107 {strides = array<i32>} : memref<6x48xf32, #tpu.memory_space<vmem>>, vector<6x48xf32>,
    %c0_i32_53 = arith.constant 0 : i32
    %109 = arith.cmpi eq, %arg1, %c0_i32_53 : i32
    %110 = arith.extui %109 : i1 to i32
    %c0_i32_54 = arith.constant 0 : i32
    %111 = arith.cmpi ne, %110, %c0_i32_54 : i32
    scf.if %111 {
      %c0_55 = arith.constant 0 : index
      %c0_56 = arith.constant 0 : index
      %112 = vector.load %arg10[%c0_55, %c0_56] : memref<8x128xf32, #tpu.memory_space<vmem>>, vector<8x128xf32>
      %113 = vector.shape_cast %112 : vector<8x128xf32> to vector<1x8x128xf32>
      %cst_57 = arith.constant dense<0.000000e+00> : vector<1xf32>
      %114 = vector.multi_reduction <add>, %113, %cst_57 [1, 2] : vector<1x8x128xf32> to vector<1xf32>
      %115 = vector.shape_cast %114 : vector<1xf32> to vector<1x1x1xf32>
      %116 = vector.extract %115[0, 0, 0] : f32 from vector<1x1x1xf32>
      %117 = vector.broadcast %116 : f32 to vector<1x1xf32>
      %c0_58 = arith.constant 0 : index
      %c0_59 = arith.constant 0 : index
      %c0_60 = arith.constant 0 : index
      %118 = vector.load %arg6[%c0_58, %c0_59, %c0_60] : memref<1x1x1xf32, #tpu.memory_space<vmem>>, vector<1x1x1xf32>
      %119 = vector.shape_cast %118 : vector<1x1x1xf32> to vector<1x1xf32>
      %120 = vector.shape_cast %117 : vector<1x1xf32> to vector<1x1x1xf32>
      tpu.vector_store %arg6[%c0_58, %c0_59, %c0_60], %120 {strides = array<i32>} : memref<1x1x1xf32, #tpu.memory_space<vmem>>, vector<1x1x1xf32>,
      %c0_61 = arith.constant 0 : index
      %c0_62 = arith.constant 0 : index
      %121 = vector.load %arg11[%c0_61, %c0_62] : memref<8x128xf32, #tpu.memory_space<vmem>>, vector<8x128xf32>
      %122 = vector.shape_cast %121 : vector<8x128xf32> to vector<1x8x128xf32>
      %cst_63 = arith.constant dense<0.000000e+00> : vector<1xf32>
      %123 = vector.multi_reduction <add>, %122, %cst_63 [1, 2] : vector<1x8x128xf32> to vector<1xf32>
      %124 = vector.shape_cast %123 : vector<1xf32> to vector<1x1x1xf32>
      %125 = vector.extract %124[0, 0, 0] : f32 from vector<1x1x1xf32>
      %126 = vector.broadcast %125 : f32 to vector<1x1xf32>
      %c0_64 = arith.constant 0 : index
      %c0_65 = arith.constant 0 : index
      %c0_66 = arith.constant 0 : index
      %127 = vector.load %arg7[%c0_64, %c0_65, %c0_66] : memref<1x1x1xf32, #tpu.memory_space<vmem>>, vector<1x1x1xf32>
      %128 = vector.shape_cast %127 : vector<1x1x1xf32> to vector<1x1xf32>
      %129 = vector.shape_cast %126 : vector<1x1xf32> to vector<1x1x1xf32>
      tpu.vector_store %arg7[%c0_64, %c0_65, %c0_66], %129 {strides = array<i32>} : memref<1x1x1xf32, #tpu.memory_space<vmem>>, vector<1x1x1xf32>,
      %c0_67 = arith.constant 0 : index
      %c0_68 = arith.constant 0 : index
      %130 = vector.load %arg12[%c0_67, %c0_68] : memref<6x48xf32, #tpu.memory_space<vmem>>, vector<6x48xf32>
      %131 = vector.shape_cast %130 : vector<6x48xf32> to vector<1x6x48xf32>
      %cst_69 = arith.constant dense<0.000000e+00> : vector<1xf32>
      %132 = vector.multi_reduction <add>, %131, %cst_69 [1, 2] : vector<1x6x48xf32> to vector<1xf32>
      %133 = vector.shape_cast %132 : vector<1xf32> to vector<1x1x1xf32>
      %134 = vector.extract %133[0, 0, 0] : f32 from vector<1x1x1xf32>
      %135 = vector.broadcast %134 : f32 to vector<1x1xf32>
      %c0_70 = arith.constant 0 : index
      %c0_71 = arith.constant 0 : index
      %c0_72 = arith.constant 0 : index
      %136 = vector.load %arg8[%c0_70, %c0_71, %c0_72] : memref<1x1x1xf32, #tpu.memory_space<vmem>>, vector<1x1x1xf32>
      %137 = vector.shape_cast %136 : vector<1x1x1xf32> to vector<1x1xf32>
      %138 = vector.shape_cast %135 : vector<1x1xf32> to vector<1x1x1xf32>
      tpu.vector_store %arg8[%c0_70, %c0_71, %c0_72], %138 {strides = array<i32>} : memref<1x1x1xf32, #tpu.memory_space<vmem>>, vector<1x1x1xf32>,
    } else {
    }
    return
  }
  func.func @transform_0(%arg0: i32, %arg1: i32) -> (i32, i32, i32) {
    %c1_i32 = arith.constant 1 : i32
    %0 = arith.muli %arg0, %c1_i32 : i32
    %1 = arith.addi %0, %arg1 : i32
    %c0_i32 = arith.constant 0 : i32
    %c0_i32_0 = arith.constant 0 : i32
    %c0_i32_1 = arith.constant 0 : i32
    return %1, %c0_i32, %c0_i32_0 : i32, i32, i32
  }
  func.func @transform_1(%arg0: i32, %arg1: i32) -> (i32, i32, i32) {
    %c1_i32 = arith.constant 1 : i32
    %0 = arith.muli %arg0, %c1_i32 : i32
    %1 = arith.addi %0, %arg1 : i32
    %c0_i32 = arith.constant 0 : i32
    %c0_i32_0 = arith.constant 0 : i32
    %c0_i32_1 = arith.constant 0 : i32
    return %1, %c0_i32, %c0_i32_0 : i32, i32, i32
  }
  func.func @transform_2(%arg0: i32, %arg1: i32) -> (i32, i32) {
    %c0_i32 = arith.constant 0 : i32
    %c0_i32_0 = arith.constant 0 : i32
    %c0_i32_1 = arith.constant 0 : i32
    return %c0_i32, %c0_i32_0 : i32, i32
  }
  func.func @transform_3(%arg0: i32, %arg1: i32) -> (i32, i32) {
    %c0_i32 = arith.constant 0 : i32
    %c0_i32_0 = arith.constant 0 : i32
    %c0_i32_1 = arith.constant 0 : i32
    return %c0_i32, %c0_i32_0 : i32, i32
  }
  func.func @transform_4(%arg0: i32, %arg1: i32) -> (i32, i32, i32) {
    %c0_i32 = arith.constant 0 : i32
    %c0_i32_0 = arith.constant 0 : i32
    %c0_i32_1 = arith.constant 0 : i32
    return %arg0, %c0_i32, %c0_i32_0 : i32, i32, i32
  }
  func.func @transform_5(%arg0: i32, %arg1: i32) -> (i32, i32, i32) {
    %c0_i32 = arith.constant 0 : i32
    %c0_i32_0 = arith.constant 0 : i32
    %c0_i32_1 = arith.constant 0 : i32
    return %arg0, %c0_i32, %c0_i32_0 : i32, i32, i32
  }
  func.func @transform_6(%arg0: i32, %arg1: i32) -> (i32, i32, i32) {
    %c0_i32 = arith.constant 0 : i32
    %c0_i32_0 = arith.constant 0 : i32
    %c0_i32_1 = arith.constant 0 : i32
    return %arg0, %c0_i32, %c0_i32_0 : i32, i32, i32
  }
}

</mosaic_0001>

<bundles_post_ra>
// kernel: tpu_custom_call.1
= control target key start
LH: loop header
LB: loop body
LE: loop exit
PB: predicated region body
PF: predicated region fallthrough
CT: control target
= control target key end

     0   :  { %12 = vsyncpa [#allocation7], 0  ;;  %v891_v5 = vmov 0   ;;  %v892_v11 = vmov 0.0   ;;  %vm111_vm0 = vcmask 130048   ;;  %vm893_vm1 = vmmov 0   ;;  %s1154_s0 = inlined_call_operand.vmem [shape: f32[1,16,128], index: 0, kind: input, shape index: {}]   ;;  %s1155_s1 = inlined_call_operand.vmem [shape: f32[1,16,128], index: 1, kind: input, shape index: {}]   ;;  %s1156_s2 = inlined_call_operand.vmem [shape: bf16[6,16], index: 2, kind: input, shape index: {}]   ;;  %s1157_s3 = inlined_call_operand.vmem [shape: bf16[128,48], index: 3, kind: input, shape index: {}]   ;;  %s1158_s4 = inlined_call_operand.hbm [shape: f32[1,1,1], index: 4, kind: output, shape index: {0}]   ;;  %s1159_s5 = inlined_call_operand.hbm [shape: f32[1,1,1], index: 5, kind: output, shape index: {1}]   ;;  %s1160_s6 = inlined_call_operand.hbm [shape: f32[1,1,1], index: 6, kind: output, shape index: {2}]  }
   0x1   :  { %v935_v0 = vld [vmem:[%s1155_s1] sm:$0xff]  ;;  %v940_v1 = vld [vmem:[%s1155_s1 + $0x8] sm:$0xff]  ;;  %147 = vmatprep.mubr.bf16.mxu0 %v891_v5  ;;  %699 = vmatprep.subr.bf16.mxu1 %v892_v11  ;;  %v992_v19 = vld [vmem:[%s1157_s3 + $0x10] sm:$0xff]  }
   0x2   :  { %v945_v2 = vld [vmem:[%s1154_s0] sm:$0xff]  ;;  %v91_v3 = vpack.c.bf16 %v940_v1, %v935_v0  ;;  %v952_v4 = vld [vmem:[%s1154_s0 + $0x8] sm:$0xff]  ;;  %v97_v6 = vmul.f32 %v935_v0, %v935_v0  ;;  %v98_v7 = vmul.f32 %v940_v1, %v940_v1  ;;  %715 = vmatprep.mubr.msk.bf16.mxu1 %vm893_vm1, %v892_v11 }
   0x3   :  { %v93_v8 = vmul.f32 %v945_v2, %v945_v2  ;;  %v89_v9 = vpack.c.bf16 %v952_v4, %v945_v2  ;;  %v94_v10 = vmul.f32 %v952_v4, %v952_v4  ;;  %v968_v12 = vld [vmem:[%s1157_s3] sm:$0xff]   ;;  %v978_v16 = vld [vmem:[%s1157_s3 + $0x8] sm:$0xff]   ;;  %v101_v17 = vmul.f32 %v935_v0, %v945_v2 }
   0x4   :  { %115 = vmatprep.subr.bf16.mxu0 %v91_v3  ;;  %v99_v13 = vpack.c.bf16 %v98_v7, %v97_v6  ;;  %v105_v14 = vld [vmem:[%s1156_s2] sm:$0x7]  ;;  %700 = vmatpush3.bf16.msra.mxu1 %v968_v12  ;;  %v102_v18 = vmul.f32 %v940_v1, %v952_v4 }
   0x5   :  { %116 = vmatpush1.bf16.msra.mxu0 %v89_v9  ;;  %v95_v15 = vpack.c.bf16 %v94_v10, %v93_v8  ;;  %701 = vmatprep.subr.bf16.mxu1 %v892_v11 }
   0x6   :  { %156 = vmatprep.subr.bf16.mxu0 %v99_v13 }
   0x8   :  { %635 = vmatmul.mubr.msk.bf16.vlgmr.msra.gmra.mrb[0].mxu0 %vm111_vm0, %v105_v14  ;;  %702 = vmatpush3.bf16.msra.mxu1 %v978_v16 }
   0x9   :  { %157 = vmatpush1.bf16.msra.mxu0 %v95_v15  ;;  %188 = vmatprep.mubr.bf16.mxu0 %v891_v5 }
   0xa   :  { %693 = vmatprep.subr.bf16.mxu0 %v892_v11 }
   0xb   :  { %13 = vsyncpa [#allocation9], 0  ;;  %703 = vmatprep.subr.bf16.mxu1 %v892_v11  ;;  %v103_v20 = vpack.c.bf16 %v102_v18, %v101_v17  ;;  %v999_v21 = vld [vmem:[%s1157_s3 + $0x18] sm:$0xff]   ;;  %v1010_v22 = vld [vmem:[%s1157_s3 + $0x20] sm:$0xff]   ;;  %vm69_vm2 = vcmask 390144   ;;  %v75_v43 = vsub.f32 %v945_v2, %v935_v0  ;;  %v76_v44 = vsub.f32 %v952_v4, %v940_v1  ;;  %s894_s21 = smov [#allocation8]  }
   0xc   :  { %704 = vmatpush3.bf16.msra.mxu1 %v992_v19  ;;  %v1017_v23 = vld [vmem:[%s1157_s3 + $0x28] sm:$0xff]   ;;  %v1029_v24 = vld [vmem:[%s1157_s3 + $0x30] sm:$0xff]   ;;  %v1038_v25 = vld [vmem:[%s1157_s3 + $0x38] sm:$0xff]   ;;  %70 = vst.msk [vmem:[#allocation5] sm:$0x3f] %vm69_vm2, %v892_v11  ;;  %vm555_vm3 = vcmask 0  }
   0xd   :  { %705 = vmatprep.subr.bf16.mxu1 %v892_v11  ;;  %v77_v45 = vmul.f32 %v75_v43, %v75_v43  ;;  %v78_v46 = vmul.f32 %v76_v44, %v76_v44  ;;  %v79_v48 = vand.u32 2147483647, %v75_v43  ;;  %v80_v49 = vand.u32 2147483647, %v76_v44  ;;  %s598_s22 = sshll.u32 %s894_s21, 4  ;;  %s895_s23 = smov [#allocation6]   ;;  %s599_s22 = int_to_ptr.vmem [resolvable:$true] %s598_s22 }
   0xe   :  { %s588_s24 = sshll.u32 %s895_s23, 4  ;;  %s821_s25 = scalar_lea.vmem %s599_s22, 16  ;;  %s589_s24 = int_to_ptr.vmem [resolvable:$true] %s588_s24 }
   0xf   :  { %v85_v47 = vadd.f32 %v78_v46, %v77_v45  ;;  %v86_v50 = vadd.f32 %v80_v49, %v79_v48  ;;  %p822_p0 = scmp.ne.s32.totalorder %s599_s22, %s821_s25  ;;  %s825_s26 = scalar_lea.vmem %s599_s22, 32 }
  0x10   :  { %636 = vmatmul.mubr.msk.bf16.vlgmr.msra.gmra.mrb[4].mxu0 %vm111_vm0, %v105_v14  ;;  %706 = vmatpush3.bf16.msra.mxu1 %v999_v21  ;;  %p826_p1 = scmp.lt.s32.totalorder %s599_s22, %s599_s22  ;;  %p827_p2 = scmp.lt.s32.totalorder %s825_s26, %s821_s25 }
  0x11   :  { %694 = vmatpush3.bf16.msra.mxu0 %v103_v20  ;;  %695 = vmatprep.mubr.msk.bf16.mxu0 %vm893_vm1, %v892_v11 }
  0x12   :  { %719 = vmatprep.subr.bf16.mxu0 %v892_v11  ;;  %707 = vmatprep.subr.bf16.mxu1 %v892_v11  ;;  %p828_p3 = por %p827_p2, %p826_p1 }
  0x13   :  { %545 = vadd.xlane.f32.xlu0 %v85_v47 }
  0x14   :  { %708 = vmatpush3.bf16.msra.mxu1 %v1010_v22  ;;  %p829_p4 = pnand %p828_p3, %p822_p0 }
  0x15   :  { %709 = vmatprep.subr.bf16.mxu1 %v892_v11 }
  0x17   :  { %558 = vadd.xlane.f32.xlu0 %v86_v50 }
  0x18   :  { %696 = vmatmul.mubr.msk.bf16.vlgmr.msra.gmra.mrb[8].mxu0 %vm111_vm0, %v105_v14  ;;  %710 = vmatpush3.bf16.msra.mxu1 %v1017_v23 }
  0x19   :  { %720 = vmatpush3.bf16.msra.mxu0 %v968_v12  ;;  %735 = vmatprep.mubr.msk.bf16.mxu0 %vm893_vm1, %v892_v11 }
  0x1a   :  { %721 = vmatprep.subr.bf16.mxu0 %v892_v11  ;;  %711 = vmatprep.subr.bf16.mxu1 %v892_v11 }
  0x1c   :  { %712 = vmatpush3.bf16.msra.mxu1 %v1029_v24 }
  0x1d   :  { %722 = vmatpush3.bf16.msra.mxu0 %v978_v16  ;;  %713 = vmatprep.subr.bf16.mxu1 %v892_v11 }
  0x1e   :  { %723 = vmatprep.subr.bf16.mxu0 %v892_v11 }
  0x20   :  { %714 = vmatpush3.bf16.msra.mxu1 %v1038_v25 }
  0x21   :  { %724 = vmatpush3.bf16.msra.mxu0 %v992_v19  ;;  %739 = vmatprep.subr.bf16.mxu1 %v892_v11 }
  0x22   :  { %725 = vmatprep.subr.bf16.mxu0 %v892_v11 }
  0x25   :  { %726 = vmatpush3.bf16.msra.mxu0 %v999_v21 }
  0x26   :  { %727 = vmatprep.subr.bf16.mxu0 %v892_v11 }
  0x29   :  { %728 = vmatpush3.bf16.msra.mxu0 %v1010_v22 }
  0x2a   :  { %729 = vmatprep.subr.bf16.mxu0 %v892_v11 }
  0x2d   :  { %730 = vmatpush3.bf16.msra.mxu0 %v1017_v23 }
  0x2e   :  { %731 = vmatprep.subr.bf16.mxu0 %v892_v11 }
  0x31   :  { %732 = vmatpush3.bf16.msra.mxu0 %v1029_v24 }
  0x32   :  { %733 = vmatprep.subr.bf16.mxu0 %v892_v11 }
  0x35   :  { %734 = vmatpush3.bf16.msra.mxu0 %v1038_v25 }
  0x36   :  { %759 = vmatprep.subr.bf16.mxu0 %v892_v11 }
  0xa0   :  { %v546_v45 = vpop.xlane.xlu0 %545 }
  0xa1   :  { %v547_v46 = vrot.slane %v546_v45, 4 }
  0xa3   :  { %v548_v47 = vadd.f32 %v547_v46, %v546_v45 }
  0xa4   :  { %v559_v48 = vpop.xlane.xlu0 %558 }
  0xa5   :  { %v549_v49 = vrot.slane %v548_v47, 2  ;;  %v560_v50 = vrot.slane %v559_v48, 4 }
  0xdb   :  { %v149_v26 = vpop.f32.mrb[0].mxu0 }
  0xdc   :  { %v253_v27 = vpack.c.bf16 %v149_v26, %v149_v26  ;;  %v151_v28 = vpop.f32.mrb[1].mxu0 }
  0xdd   :  { %v342_v29 = vpack.c.bf16 %v151_v28, %v151_v28  ;;  %v153_v30 = vpop.f32.mrb[2].mxu0 }
  0xde   :  { %v154_v31 = vpop.f32.mrb[3].mxu0  ;;  %716 = vmatmul.mubr.bf16.vlgmr.msra.gmra.mrb[0].mxu1 %v253_v27 }
  0xdf   :  { %740 = vmatpush3.bf16.msra.mxu1 %v968_v12  ;;  %736 = vmatmul.mubr.bf16.vlgmr.msra.gmra.mrb[12].mxu0 %v342_v29 }
  0xe0   :  { %760 = vmatpush3.bf16.msra.mxu0 %v968_v12  ;;  %741 = vmatprep.subr.bf16.mxu1 %v892_v11 }
  0xe1   :  { %761 = vmatprep.subr.bf16.mxu0 %v892_v11  ;;  %755 = vmatprep.mubr.msk.bf16.mxu1 %vm893_vm1, %v892_v11 }
  0xe2   :  { %775 = vmatprep.mubr.msk.bf16.mxu0 %vm893_vm1, %v892_v11 }
  0xe3   :  { %742 = vmatpush3.bf16.msra.mxu1 %v978_v16  ;;  %v190_v32 = vpop.f32.mrb[4].mxu0 }
  0xe4   :  { %762 = vmatpush3.bf16.msra.mxu0 %v978_v16  ;;  %743 = vmatprep.subr.bf16.mxu1 %v892_v11  ;;  %v192_v33 = vpop.f32.mrb[5].mxu0  ;;  %v383_v40 = vpack.c.bf16 %v190_v32, %v190_v32 }
  0xe5   :  { %763 = vmatprep.subr.bf16.mxu0 %v892_v11  ;;  %v194_v34 = vpop.f32.mrb[6].mxu0  ;;  %v384_v41 = vpack.c.bf16 %v192_v33, %v192_v33 }
  0xe6   :  { %v195_v35 = vpop.f32.mrb[7].mxu0 }
  0xe7   :  { %744 = vmatpush3.bf16.msra.mxu1 %v992_v19 }
  0xe8   :  { %764 = vmatpush3.bf16.msra.mxu0 %v992_v19  ;;  %745 = vmatprep.subr.bf16.mxu1 %v892_v11 }
  0xe9   :  { %765 = vmatprep.subr.bf16.mxu0 %v892_v11 }
  0xeb   :  { %746 = vmatpush3.bf16.msra.mxu1 %v999_v21  ;;  %v231_v36 = vpop.f32.mrb[8].mxu0 }
  0xec   :  { %766 = vmatpush3.bf16.msra.mxu0 %v999_v21  ;;  %747 = vmatprep.subr.bf16.mxu1 %v892_v11  ;;  %v697_v37 = vpop.f32.mrb[9].mxu0  ;;  %v385_v42 = vpack.c.bf16 %v231_v36, %v231_v36 }
  0xed   :  { %767 = vmatprep.subr.bf16.mxu0 %v892_v11  ;;  %v234_v38 = vpop.f32.mrb[10].mxu0 }
  0xee   :  { %v698_v39 = vpop.f32.mrb[11].mxu0 }
  0xef   :  { %748 = vmatpush3.bf16.msra.mxu1 %v1010_v22 }
  0xf0   :  { %768 = vmatpush3.bf16.msra.mxu0 %v1010_v22  ;;  %749 = vmatprep.subr.bf16.mxu1 %v892_v11 }
  0xf1   :  { %769 = vmatprep.subr.bf16.mxu0 %v892_v11 }
  0xf3   :  { %750 = vmatpush3.bf16.msra.mxu1 %v1017_v23 }
  0xf4   :  { %770 = vmatpush3.bf16.msra.mxu0 %v1017_v23  ;;  %751 = vmatprep.subr.bf16.mxu1 %v892_v11 }
  0xf5   :  { %771 = vmatprep.subr.bf16.mxu0 %v892_v11 }
  0xf7   :  { %752 = vmatpush3.bf16.msra.mxu1 %v1029_v24 }
  0xf8   :  { %772 = vmatpush3.bf16.msra.mxu0 %v1029_v24  ;;  %753 = vmatprep.subr.bf16.mxu1 %v892_v11 }
  0xf9   :  { %773 = vmatprep.subr.bf16.mxu0 %v892_v11 }
  0xfb   :  { %754 = vmatpush3.bf16.msra.mxu1 %v1038_v25 }
  0xfc   :  { %774 = vmatpush3.bf16.msra.mxu0 %v1038_v25  ;;  %779 = vmatprep.subr.bf16.mxu1 %v892_v11 }
  0xfe   :  { %756 = vmatmul.mubr.bf16.vlgmr.msra.gmra.mrb[4].mxu1 %v383_v40  ;;  %v535_v40 = vld [vmem:[#allocation5] sm:$0x3f] }
  0xff   :  { %776 = vmatmul.mubr.bf16.vlgmr.msra.gmra.mrb[16].mxu0 %v384_v41  ;;  %780 = vmatpush3.bf16.msra.mxu1 %v968_v12 }
 0x100   :  { %781 = vmatprep.subr.bf16.mxu1 %v892_v11  ;;  %795 = vmatprep.mubr.msk.bf16.mxu1 %vm893_vm1, %v892_v11 }
 0x103   :  { %782 = vmatpush3.bf16.msra.mxu1 %v978_v16 }
 0x104   :  { %783 = vmatprep.subr.bf16.mxu1 %v892_v11 }
 0x107   :  { %784 = vmatpush3.bf16.msra.mxu1 %v992_v19 }
 0x108   :  { %785 = vmatprep.subr.bf16.mxu1 %v892_v11 }
 0x10b   :  { %786 = vmatpush3.bf16.msra.mxu1 %v999_v21 }
 0x10c   :  { %787 = vmatprep.subr.bf16.mxu1 %v892_v11 }
 0x10f   :  { %788 = vmatpush3.bf16.msra.mxu1 %v1010_v22 }
 0x110   :  { %789 = vmatprep.subr.bf16.mxu1 %v892_v11 }
 0x113   :  { %790 = vmatpush3.bf16.msra.mxu1 %v1017_v23 }
 0x114   :  { %791 = vmatprep.subr.bf16.mxu1 %v892_v11 }
 0x117   :  { %792 = vmatpush3.bf16.msra.mxu1 %v1029_v24 }
 0x118   :  { %793 = vmatprep.subr.bf16.mxu1 %v892_v11 }
 0x11b   :  { %794 = vmatpush3.bf16.msra.mxu1 %v1038_v25 }
 0x11e   :  { %796 = vmatmul.mubr.bf16.vlgmr.msra.gmra.mrb[8].mxu1 %v385_v42 }
 0x1b1   :  { %v336_v51 = vpop.f32.mrb[0].mxu1 }
 0x1b2   :  { %v386_v52 = vadd.f32 1.0, %v336_v51  ;;  %v717_v53 = vpop.f32.mrb[1].mxu1  ;;  %v377_v54 = vpop.f32.mrb[12].mxu0  ;;  %v393_v3 = vmul.f32 2.0, %v336_v51 }
 0x1b3   :  { %v388_v55 = vadd.f32 1.0, %v377_v54  ;;  %v339_v56 = vpop.f32.mrb[2].mxu1  ;;  %v737_v57 = vpop.f32.mrb[13].mxu0  ;;  %v436_v5 = vmul.f32 2.0, %v377_v54 }
 0x1b4   :  { %v387_v58 = vmul.f32 0.5, %v386_v52  ;;  %v718_v59 = vpop.f32.mrb[3].mxu1  ;;  %v380_v60 = vpop.f32.mrb[14].mxu0  ;;  %v550_v52 = vadd.f32 %v549_v49, %v548_v47 }
 0x1b5   :  { %v389_v61 = vmul.f32 0.5, %v388_v55  ;;  %v738_v62 = vpop.f32.mrb[15].mxu0 }
 0x1b6   :  { %v390_v63 = vmul.f32 %v387_v58, %v387_v58 }
 0x1b7   :  { %v392_v0 = vmul.f32 %v389_v61, %v387_v58  ;;  %v391_v1 = vmul.f32 %v389_v61, %v389_v61 }
 0x1b9   :  { %v530_v2 = vadd.f32 %v391_v1, %v390_v63  ;;  %v525_v33 = vmul.f32 2.0, %v392_v0 }
 0x1bb   :  { %v531_v22 = vadd.f32 0.0001, %v530_v2  ;;  %v526_v36 = vadd.f32 0.0001, %v525_v33 }
 0x1d1   :  { %v428_v4 = vpop.f32.mrb[4].mxu1 }
 0x1d2   :  { %v429_v6 = vadd.f32 %v428_v4, %v393_v3  ;;  %v757_v7 = vpop.f32.mrb[5].mxu1  ;;  %v471_v8 = vpop.f32.mrb[16].mxu0 }
 0x1d3   :  { %v472_v9 = vadd.f32 %v471_v8, %v436_v5  ;;  %v431_v10 = vpop.f32.mrb[6].mxu1  ;;  %v777_v11 = vpop.f32.mrb[17].mxu0 }
 0x1d4   :  { %v434_v12 = vadd.f32 1.0, %v429_v6  ;;  %v758_v13 = vpop.f32.mrb[7].mxu1  ;;  %v474_v14 = vpop.f32.mrb[18].mxu0 }
 0x1d5   :  { %v477_v15 = vadd.f32 1.0, %v472_v9  ;;  %v778_v16 = vpop.f32.mrb[19].mxu0 }
 0x1d6   :  { %v435_v17 = vmul.f32 0.25, %v434_v12 }
 0x1d7   :  { %v478_v18 = vmul.f32 0.25, %v477_v15 }
 0x1d8   :  { %v522_v19 = vsub.f32 %v435_v17, %v390_v63 }
 0x1d9   :  { %v523_v20 = vsub.f32 %v478_v18, %v391_v1 }
 0x1db   :  { %v532_v21 = vadd.f32 %v523_v20, %v522_v19 }
 0x1dd   :  { %v533_v23 = vadd.f32 0.0009, %v532_v21 }
 0x1df   :  { %v534_v24 = vmul.f32 %v533_v23, %v531_v22 }
 0x1e1   :  { %819 = vrcp.f32 %v534_v24 }
 0x1eb   :  { %v820_v39 = vpop.eup %819 }
 0x1f1   :  { %v513_v25 = vpop.f32.mrb[8].mxu1 }
 0x1f2   :  { %v514_v26 = vadd.f32 %v513_v25, %v336_v51  ;;  %v797_v27 = vpop.f32.mrb[9].mxu1  ;;  %v561_v51 = vadd.f32 %v560_v50, %v559_v48 }
 0x1f3   :  { %v516_v28 = vpop.f32.mrb[10].mxu1 }
 0x1f4   :  { %v519_v29 = vadd.f32 %v514_v26, %v377_v54  ;;  %v798_v30 = vpop.f32.mrb[11].mxu1  ;;  %v562_v53 = vrot.slane %v561_v51, 2  ;;  %v551_v54 = vrot.slane %v550_v52, 1 }
 0x1f6   :  { %v520_v31 = vadd.f32 1.0, %v519_v29  ;;  %v563_v55 = vadd.f32 %v562_v53, %v561_v51  ;;  %v552_v56 = vadd.f32 %v551_v54, %v550_v52 }
 0x1f8   :  { %v521_v32 = vmul.f32 0.25, %v520_v31  ;;  %799 = vpush %v552_v56  ;;  %v564_v57 = vrot.slane %v563_v55, 1 }
 0x1fa   :  { %v524_v34 = vsub.f32 %v521_v32, %v392_v0  ;;  %v565_v58 = vadd.f32 %v564_v57, %v563_v55 }
 0x1fc   :  { %v527_v35 = vmul.f32 2.0, %v524_v34  ;;  %801 = vpush %v565_v58 }
 0x1fe   :  { %v528_v37 = vadd.f32 0.0009, %v527_v35 }
 0x200   :  { %v529_v38 = vmul.f32 %v528_v37, %v526_v36 }
 0x202   :  { %v537_v41 = vmul.f32 %v820_v39, %v529_v38 }
 0x204   :  { %v538_v42 = vadd.f32 %v537_v41, %v535_v40 }
 0x206   :  { %540 = vst.msk [vmem:[#allocation5] sm:$0x3f] %vm69_vm2, %v538_v42 }
 0x20d   :  { %v569_v43 = vld [vmem:[#allocation5] sm:$0x3f] }
 0x20e   :  { %v570_v44 = vsel %vm69_vm2, %v569_v43, 0.0 }
 0x20f   :  { %571 = vadd.xlane.f32.xlu1 %v570_v44 }
 0x229   :  { %s800_s3 = spop %799 }
 0x22a   :  { %v554_v59 = vstv %s800_s3 }
 0x22b   :  { %556 = vst.msk [vmem:[#allocation6] sm:$0x1] %vm555_vm3, %v554_v59 }
 0x22d   :  { %s802_s20 = spop %801 }
 0x22e   :  { %v567_v60 = vstv %s802_s20 }
 0x22f   :  { %568 = vst.msk [vmem:[#allocation8] sm:$0x1] %vm555_vm3, %v567_v60 }
 0x230   :  { %832 = shalt.err (!%p829_p4)
}
 0x231   :  { %s833_s0 = scalar_lea.hbm %s1159_s5, 16 }
 0x232   :  { %p834_p5 = scmp.ne.s32.totalorder %s1159_s5, %s833_s0  ;;  %p837_p6 = scmp.lt.u32.totalorder %s833_s0, %s1159_s5 }
 0x234   :  { %p839_p7 = pnand %p837_p6, %p834_p5 }
 0x236   :  { %842 = shalt.err (!%p839_p7)
}
 0x237   :  { %601 = dma.vmem_to_hbm [thread:$0]  %s599_s22, 16, %s1159_s5, [#allocation9]  }
 0x238   :  { %s843_s9 = scalar_lea.vmem %s589_s24, 16  ;;  %s847_s10 = scalar_lea.vmem %s589_s24, 32 }
 0x239   :  { %p844_p8 = scmp.ne.s32.totalorder %s589_s24, %s843_s9  ;;  %p848_p9 = scmp.lt.s32.totalorder %s589_s24, %s589_s24 }
 0x23a   :  { %p849_p10 = scmp.lt.s32.totalorder %s847_s10, %s843_s9 }
 0x23c   :  { %p850_p11 = por %p849_p10, %p848_p9 }
 0x23e   :  { %p851_p12 = pnand %p850_p11, %p844_p8 }
 0x240   :  { %854 = shalt.err (!%p851_p12)
}
 0x241   :  { %s855_s13 = scalar_lea.hbm %s1158_s4, 16 }
 0x242   :  { %p856_p13 = scmp.ne.s32.totalorder %s1158_s4, %s855_s13  ;;  %p859_p0 = scmp.lt.u32.totalorder %s855_s13, %s1158_s4 }
 0x244   :  { %p861_p1 = pnand %p859_p0, %p856_p13 }
 0x246   :  { %864 = shalt.err (!%p861_p1)
}
 0x247   :  { %591 = dma.vmem_to_hbm [thread:$0]  %s589_s24, 16, %s1158_s4, [#allocation7]  }
 0x248   :  { %s896_s19 = smov [#allocation10]  }
 0x249   :  { %s608_s3 = sshll.u32 %s896_s19, 4  ;;  %s609_s3 = int_to_ptr.vmem [resolvable:$true] %s608_s3 }
 0x24a   :  { %s865_s21 = scalar_lea.vmem %s609_s3, 16  ;;  %s869_s22 = scalar_lea.vmem %s609_s3, 32 }
 0x24b   :  { %p866_p2 = scmp.ne.s32.totalorder %s609_s3, %s865_s21  ;;  %p870_p3 = scmp.lt.s32.totalorder %s609_s3, %s609_s3 }
 0x24c   :  { %p871_p4 = scmp.lt.s32.totalorder %s869_s22, %s865_s21 }
 0x24e   :  { %p872_p5 = por %p871_p4, %p870_p3 }
 0x250   :  { %p873_p6 = pnand %p872_p5, %p866_p2 }
 0x29c   :  { %v572_v61 = vpop.xlane.xlu1 %571 }
 0x29d   :  { %v573_v62 = vrot.slane %v572_v61, 4 }
 0x29f   :  { %v574_v63 = vadd.f32 %v573_v62, %v572_v61 }
 0x2a1   :  { %v575_v0 = vrot.slane %v574_v63, 2 }
 0x2a3   :  { %v576_v1 = vadd.f32 %v575_v0, %v574_v63 }
 0x2a5   :  { %v577_v2 = vrot.slane %v576_v1, 1 }
 0x2a7   :  { %v578_v3 = vadd.f32 %v577_v2, %v576_v1 }
 0x2a9   :  { %803 = vpush %v578_v3 }
 0x2da   :  { %s804_s20 = spop %803 }
 0x2db   :  { %v580_v4 = vstv %s804_s20 }
 0x2dc   :  { %581 = vst.msk [vmem:[#allocation10] sm:$0x1] %vm555_vm3, %v580_v4 }
 0x2dd   :  { %876 = shalt.err (!%p873_p6)
}
 0x2de   :  { %s877_s24 = scalar_lea.hbm %s1160_s6, 16 }
 0x2df   :  { %p878_p7 = scmp.ne.s32.totalorder %s1160_s6, %s877_s24  ;;  %p881_p8 = scmp.lt.u32.totalorder %s877_s24, %s1160_s6 }
 0x2e1   :  { %p883_p9 = pnand %p881_p8, %p878_p7 }
 0x2e3   :  { %886 = shalt.err (!%p883_p9)
}
 0x2e4   :  { %611 = dma.vmem_to_hbm [thread:$0]  %s609_s3, 16, %s1160_s6, [#allocation9]  }
 0x2e5   :  { %887 = dma.done.wait [#allocation7], 16  }
 0x2e6   :  { %888 = vsyncadd [#allocation7], 4294967280 }
 0x2e7   :  { %889 = dma.done.wait [#allocation9], 32  }
 0x2e8   :  { %890 = vsyncadd [#allocation9], 4294967264 }
 0x2e9   :  { %621 = vsyncpa [#allocation7], 1 }
 0x2ea   :  { %622 = vsyncpa [#allocation9], 1 }

</bundles_post_ra>
